<compile_context>
chip_gen: v7x
topology: tpu7x:2x2x1
jax: 0.10.0
libtpu: 0.0.40
codegen_flags: <defaults>
</compile_context>

<pallas_src>
import functools
import math

import jax
import jax.numpy as jnp
from jax import lax
from jax.experimental import pallas as pl
from jax.experimental.pallas import tpu as pltpu


def _aam_kernel(emb_ref, w_ref, tgt_ref, out_ref, m_sc, l_sc, cosy_sc, *,
                scale, margin, eps):
    c_idx = pl.program_id(1)
    n_c = pl.num_programs(1)
    bt = emb_ref.shape[0]
    ct, e = w_ref.shape

    @pl.when(c_idx == 0)
    def _init():
        m_sc[...] = jnp.full(m_sc.shape, -jnp.inf, dtype=jnp.float32)
        l_sc[...] = jnp.zeros(l_sc.shape, dtype=jnp.float32)
        cosy_sc[...] = jnp.zeros(cosy_sc.shape, dtype=jnp.float32)

    emb = emb_ref[...]                                   # (Bt, E)
    w = w_ref[...]                                       # (Ct, E) streamed tile
    wf = w.astype(jnp.float32)

    # --- per-class inverse norms, produced lane-dense as (1, Ct) via the MXU ---
    ones_row = jnp.ones((1, e), dtype=jnp.float32)
    ssq = lax.dot_general(ones_row, wf * wf,
                          dimension_numbers=(((1,), (1,)), ((), ())),
                          preferred_element_type=jnp.float32)     # (1, Ct)
    inv_norm = lax.rsqrt(jnp.maximum(ssq, 1e-24))        # == 1/max(||row||, 1e-12)

    # --- cosines: contract E of both operands (no weight transpose), f32 acc ---
    raw = lax.dot_general(emb, w,
                          dimension_numbers=(((1,), (1,)), ((), ())),
                          preferred_element_type=jnp.float32)     # (Bt, Ct)
    cos = jnp.clip(raw * inv_norm, -1.0, 1.0)                     # (Bt, Ct)
    s = scale * cos                                               # scaled logits

    # --- pick up the target-class cosine for rows whose target is in this tile ---
    col_ids = lax.broadcasted_iota(jnp.int32, (bt, ct), 1) + c_idx * ct
    is_tgt = col_ids == tgt_ref[...]                              # (Bt,1) bcast
    cosy_sc[...] += jnp.sum(jnp.where(is_tgt, cos, 0.0), axis=1, keepdims=True)

    # --- online (running-max) accumulation of sum_j exp(scale * cos_j) ---
    m_prev = m_sc[...]
    m_new = jnp.maximum(m_prev, jnp.max(s, axis=1, keepdims=True))
    l_sc[...] = (l_sc[...] * jnp.exp(m_prev - m_new)
                 + jnp.sum(jnp.exp(s - m_new), axis=1, keepdims=True))
    m_sc[...] = m_new

    # --- finalize: margin rotation on the target logits + stable log-denominator ---
    @pl.when(c_idx == n_c - 1)
    def _finalize():
        cos_y = cosy_sc[...]                                      # (Bt, 1)
        s_y = scale * cos_y
        # cos(arccos(x) + m) = x*cos(m) - sqrt(1 - x^2)*sin(m)  (exact on [-1, 1])
        sin_y = jnp.sqrt(jnp.maximum(1.0 - cos_y * cos_y, 0.0))
        numerator = scale * (cos_y * math.cos(margin) - sin_y * math.sin(margin))

        m = m_sc[...]
        l = l_sc[...]
        big = jnp.maximum(m, numerator)
        # denominator + eps = exp(num) + (sum_j exp(s_j) - exp(s_y)) + eps,
        # evaluated in max-subtracted form (robust for large scale / huge C).
        excluded = jnp.maximum(l * jnp.exp(m - big) - jnp.exp(s_y - big), 0.0)
        t = jnp.exp(numerator - big) + excluded + eps * jnp.exp(-big)
        out_ref[...] = numerator - (big + jnp.log(t))             # per-sample term


def angular_margin_loss(embedding, weight, targets, *, scale, margin, eps=1e-6,
                        block_b=None, block_c=None, compute_dtype=jnp.float32):
    """embedding: (B, E), weight: (C, E), targets: (B,) int -> scalar f32 loss."""
    B, E = embedding.shape
    C, E2 = weight.shape
    assert E == E2, (embedding.shape, weight.shape)

    if block_b is None:
        block_b = B if B <= 128 else 128
    if block_c is None:
        block_c = C if C <= 512 else 512
    assert B % block_b == 0 and (block_b == B or block_b % 8 == 0), (B, block_b)
    assert C % block_c == 0 and (block_c == C or block_c % 128 == 0), (C, block_c)

    grid = (B // block_b, C // block_c)

    emb_c = embedding.astype(compute_dtype)
    w_c = weight.astype(compute_dtype)
    tgt2d = targets.reshape(B, 1).astype(jnp.int32)

    kernel = functools.partial(_aam_kernel, scale=float(scale),
                               margin=float(margin), eps=float(eps))

    ds = jnp.dtype(compute_dtype).itemsize
    cost = pl.CostEstimate(
        flops=2 * B * C * E + 2 * C * E,
        transcendentals=B * C + C,
        bytes_accessed=C * E * ds + B * E * ds + 2 * B * 4)

    # VMEM budget: double-buffered weight/embedding tiles + (Bt,Ct) f32 temporaries
    # + tiny accumulators; capped well below v7x's 64 MiB physical VMEM.
    vmem_est = (2 * block_c * E * ds + 2 * block_b * E * ds
                + 6 * block_b * block_c * 4
                + 4 * block_b * 128 * 4)
    vmem_limit = int(min(max(2 * vmem_est, 16 << 20), 48 << 20))

    grid_spec = pltpu.PrefetchScalarGridSpec(
        num_scalar_prefetch=0,
        grid=grid,
        in_specs=[
            pl.BlockSpec((block_b, E), lambda b, c: (b, 0)),   # embedding (resident over c)
            pl.BlockSpec((block_c, E), lambda b, c: (c, 0)),   # streamed weight tile
            pl.BlockSpec((block_b, 1), lambda b, c: (b, 0)),   # int32 targets
        ],
        out_specs=pl.BlockSpec((block_b, 1), lambda b, c: (b, 0)),
        scratch_shapes=[pltpu.VMEM((block_b, 1), jnp.float32),   # running max m
                        pltpu.VMEM((block_b, 1), jnp.float32),   # running sum l
                        pltpu.VMEM((block_b, 1), jnp.float32)],  # target cosine
    )

    per_sample = pl.pallas_call(
        kernel,
        out_shape=jax.ShapeDtypeStruct((B, 1), jnp.float32),
        grid_spec=grid_spec,
        compiler_params=pltpu.CompilerParams(
            dimension_semantics=("parallel", "arbitrary"),
            vmem_limit_bytes=vmem_limit),
        cost_estimate=cost,
    )(emb_c, w_c, tgt2d)

    return -jnp.mean(per_sample)


def _reference(embedding, weight, targets, scale, margin, eps=1e-6):
    """Plain-JAX mirror of the PyTorch forward (arccos path)."""
    w_n = weight / jnp.maximum(
        jnp.linalg.norm(weight, axis=1, keepdims=True), 1e-12)
    cos = jnp.clip(jnp.dot(embedding, w_n.T, precision=lax.Precision.HIGHEST),
                   -1.0, 1.0)
    angles = jnp.arccos(cos)
    margined = scale * jnp.cos(angles + margin)
    numerator = margined[jnp.arange(embedding.shape[0]), targets]
    mask = jax.nn.one_hot(targets, weight.shape[0], dtype=jnp.float32)
    excluded_sum = jnp.sum((1.0 - mask) * jnp.exp(scale * cos), axis=1)
    denom = jnp.exp(numerator) + excluded_sum
    return -jnp.mean(numerator - jnp.log(denom + eps))


if __name__ == "__main__":
    # Small but tiling-exercising shapes: grid = (B/Bt, C/Ct) = (2, 4).
    B, E, C = 16, 64, 512
    scale, margin = 30.0, 0.2

    key = jax.random.PRNGKey(0)
    k_emb, k_w, k_t = jax.random.split(key, 3)
    embedding = jax.random.normal(k_emb, (B, E), dtype=jnp.float32)
    weight = jax.random.normal(k_w, (C, E), dtype=jnp.float32)  # Linear(E->C, bias=False)
    targets = jax.random.randint(k_t, (B,), 0, C, dtype=jnp.int32)

    loss = angular_margin_loss(embedding, weight, targets,
                               scale=scale, margin=margin,
                               block_b=8, block_c=128)
    loss = jax.block_until_ready(loss)

    ref = _reference(embedding, weight, targets, scale, margin)
    assert jnp.allclose(loss, ref, rtol=2e-3, atol=2e-3), (loss, ref)

    print("KERNEL_OK")
</pallas_src>

<mosaic_0001>
module attributes {stable_mosaic.version = 11 : i64} {
  func.func @_aam_kernel(%arg0: i32, %arg1: i32, %arg2: memref<8x64xf32, #tpu.memory_space<vmem>>, %arg3: memref<128x64xf32, #tpu.memory_space<vmem>>, %arg4: memref<8x1xi32, #tpu.memory_space<vmem>>, %arg5: memref<8x1xf32, #tpu.memory_space<vmem>>, %arg6: memref<8x1xf32, #tpu.memory_space<vmem>>, %arg7: memref<8x1xf32, #tpu.memory_space<vmem>>, %arg8: memref<8x1xf32, #tpu.memory_space<vmem>>) attributes {dimension_semantics = [#tpu.dimension_semantics<parallel>, #tpu.dimension_semantics<arbitrary>], iteration_bounds = array<i64: 2, 4>, scalar_prefetch = 0 : i64, scratch_operands = 3 : i64, tpu.core_type = #tpu.core_type<tc>, window_params = [{transform_indices = @transform_0, window_bounds = array<i64: 8, 64>}, {transform_indices = @transform_1, window_bounds = array<i64: 128, 64>}, {transform_indices = @transform_2, window_bounds = array<i64: 8, 1>}, {transform_indices = @transform_3, window_bounds = array<i64: 8, 1>}]} {
    %c0_i32 = arith.constant 0 : i32
    %0 = arith.cmpi eq, %arg1, %c0_i32 : i32
    %1 = arith.extui %0 : i1 to i32
    %c0_i32_0 = arith.constant 0 : i32
    %2 = arith.cmpi ne, %1, %c0_i32_0 : i32
    scf.if %2 {
      %cst_29 = arith.constant 0xFF800000 : f32
      %53 = vector.broadcast %cst_29 : f32 to vector<8x1xf32>
      %c0_30 = arith.constant 0 : index
      %c0_31 = arith.constant 0 : index
      %54 = vector.load %arg6[%c0_30, %c0_31] : memref<8x1xf32, #tpu.memory_space<vmem>>, vector<8x1xf32>
      tpu.vector_store %arg6[%c0_30, %c0_31], %53 {strides = array<i32>} : memref<8x1xf32, #tpu.memory_space<vmem>>, vector<8x1xf32>,
      %cst_32 = arith.constant 0.000000e+00 : f32
      %55 = vector.broadcast %cst_32 : f32 to vector<8x1xf32>
      %c0_33 = arith.constant 0 : index
      %c0_34 = arith.constant 0 : index
      %56 = vector.load %arg7[%c0_33, %c0_34] : memref<8x1xf32, #tpu.memory_space<vmem>>, vector<8x1xf32>
      tpu.vector_store %arg7[%c0_33, %c0_34], %55 {strides = array<i32>} : memref<8x1xf32, #tpu.memory_space<vmem>>, vector<8x1xf32>,
      %cst_35 = arith.constant 0.000000e+00 : f32
      %57 = vector.broadcast %cst_35 : f32 to vector<8x1xf32>
      %c0_36 = arith.constant 0 : index
      %c0_37 = arith.constant 0 : index
      %58 = vector.load %arg8[%c0_36, %c0_37] : memref<8x1xf32, #tpu.memory_space<vmem>>, vector<8x1xf32>
      tpu.vector_store %arg8[%c0_36, %c0_37], %57 {strides = array<i32>} : memref<8x1xf32, #tpu.memory_space<vmem>>, vector<8x1xf32>,
    } else {
    }
    %c0 = arith.constant 0 : index
    %c0_1 = arith.constant 0 : index
    %3 = vector.load %arg2[%c0, %c0_1] : memref<8x64xf32, #tpu.memory_space<vmem>>, vector<8x64xf32>
    %c0_2 = arith.constant 0 : index
    %c0_3 = arith.constant 0 : index
    %4 = vector.load %arg3[%c0_2, %c0_3] : memref<128x64xf32, #tpu.memory_space<vmem>>, vector<128x64xf32>
    %cst = arith.constant 1.000000e+00 : f32
    %5 = vector.broadcast %cst : f32 to vector<1x64xf32>
    %6 = arith.mulf %4, %4 : vector<128x64xf32>
    %cst_4 = arith.constant dense<0.000000e+00> : vector<1x128xf32>
    %7 = tpu.matmul %5, %6, %cst_4 {dimension_numbers = #tpu.dot_dimension_numbers<[1], [1], [0], [0], [0, 0, 1, 0], [], []>} : vector<1x64xf32>, vector<128x64xf32>, vector<1x128xf32> -> vector<1x128xf32>
    %cst_5 = arith.constant 1.000000e-24 : f32
    %8 = vector.broadcast %cst_5 : f32 to vector<1x128xf32>
    %9 = arith.maximumf %7, %8 : vector<1x128xf32>
    %10 = math.rsqrt %9 : vector<1x128xf32>
    %cst_6 = arith.constant dense<0.000000e+00> : vector<8x128xf32>
    %11 = tpu.matmul %3, %4, %cst_6 {dimension_numbers = #tpu.dot_dimension_numbers<[1], [1], [0], [0], [0, 0, 1, 0], [], []>} : vector<8x64xf32>, vector<128x64xf32>, vector<8x128xf32> -> vector<8x128xf32>
    %12 = vector.broadcast %10 : vector<1x128xf32> to vector<8x128xf32>
    %13 = arith.mulf %11, %12 : vector<8x128xf32>
    %cst_7 = arith.constant -1.000000e+00 : f32
    %cst_8 = arith.constant 1.000000e+00 : f32
    %14 = vector.broadcast %cst_7 : f32 to vector<8x128xf32>
    %15 = arith.maximumf %14, %13 : vector<8x128xf32>
    %16 = vector.broadcast %cst_8 : f32 to vector<8x128xf32>
    %17 = arith.minimumf %16, %15 : vector<8x128xf32>
    %cst_9 = arith.constant 3.000000e+01 : f32
    %18 = vector.broadcast %cst_9 : f32 to vector<8x128xf32>
    %19 = arith.mulf %18, %17 : vector<8x128xf32>
    %20 = tpu.iota {dimensions = array<i32: 1>} : vector<8x128xi32>
    %c128_i32 = arith.constant 128 : i32
    %21 = arith.muli %arg1, %c128_i32 : i32
    %22 = vector.broadcast %21 : i32 to vector<8x128xi32>
    %23 = arith.addi %20, %22 : vector<8x128xi32>
    %c0_10 = arith.constant 0 : index
    %c0_11 = arith.constant 0 : index
    %24 = vector.load %arg4[%c0_10, %c0_11] : memref<8x1xi32, #tpu.memory_space<vmem>>, vector<8x1xi32>
    %25 = vector.broadcast %24 : vector<8x1xi32> to vector<8x128xi32>
    %26 = arith.cmpi eq, %23, %25 : vector<8x128xi32>
    %c0_12 = arith.constant 0 : index
    %c0_13 = arith.constant 0 : index
    %27 = vector.load %arg8[%c0_12, %c0_13] : memref<8x1xf32, #tpu.memory_space<vmem>>, vector<8x1xf32>
    %cst_14 = arith.constant 0.000000e+00 : f32
    %28 = vector.broadcast %cst_14 : f32 to vector<8x128xf32>
    %29 = arith.select %26, %17, %28 : vector<8x128xi1>, vector<8x128xf32>
    %cst_15 = arith.constant dense<0.000000e+00> : vector<8xf32>
    %30 = vector.multi_reduction <add>, %29, %cst_15 [1] : vector<8x128xf32> to vector<8xf32>
    %31 = vector.shape_cast %30 : vector<8xf32> to vector<8x1xf32>
    %32 = arith.addf %27, %31 : vector<8x1xf32>
    %c0_16 = arith.constant 0 : index
    %c0_17 = arith.constant 0 : index
    %33 = vector.load %arg8[%c0_16, %c0_17] : memref<8x1xf32, #tpu.memory_space<vmem>>, vector<8x1xf32>
    tpu.vector_store %arg8[%c0_16, %c0_17], %32 {strides = array<i32>} : memref<8x1xf32, #tpu.memory_space<vmem>>, vector<8x1xf32>,
    %c0_18 = arith.constant 0 : index
    %c0_19 = arith.constant 0 : index
    %34 = vector.load %arg6[%c0_18, %c0_19] : memref<8x1xf32, #tpu.memory_space<vmem>>, vector<8x1xf32>
    %cst_20 = arith.constant dense<0xFF800000> : vector<8xf32>
    %35 = vector.multi_reduction <maximumf>, %19, %cst_20 [1] : vector<8x128xf32> to vector<8xf32>
    %36 = vector.shape_cast %35 : vector<8xf32> to vector<8x1xf32>
    %37 = arith.maximumf %34, %36 : vector<8x1xf32>
    %c0_21 = arith.constant 0 : index
    %c0_22 = arith.constant 0 : index
    %38 = vector.load %arg7[%c0_21, %c0_22] : memref<8x1xf32, #tpu.memory_space<vmem>>, vector<8x1xf32>
    %39 = arith.subf %34, %37 : vector<8x1xf32>
    %40 = math.exp %39 : vector<8x1xf32>
    %41 = arith.mulf %38, %40 : vector<8x1xf32>
    %42 = vector.broadcast %37 : vector<8x1xf32> to vector<8x128xf32>
    %43 = arith.subf %19, %42 : vector<8x128xf32>
    %44 = math.exp %43 : vector<8x128xf32>
    %cst_23 = arith.constant dense<0.000000e+00> : vector<8xf32>
    %45 = vector.multi_reduction <add>, %44, %cst_23 [1] : vector<8x128xf32> to vector<8xf32>
    %46 = vector.shape_cast %45 : vector<8xf32> to vector<8x1xf32>
    %47 = arith.addf %41, %46 : vector<8x1xf32>
    %c0_24 = arith.constant 0 : index
    %c0_25 = arith.constant 0 : index
    %48 = vector.load %arg7[%c0_24, %c0_25] : memref<8x1xf32, #tpu.memory_space<vmem>>, vector<8x1xf32>
    tpu.vector_store %arg7[%c0_24, %c0_25], %47 {strides = array<i32>} : memref<8x1xf32, #tpu.memory_space<vmem>>, vector<8x1xf32>,
    %c0_26 = arith.constant 0 : index
    %c0_27 = arith.constant 0 : index
    %49 = vector.load %arg6[%c0_26, %c0_27] : memref<8x1xf32, #tpu.memory_space<vmem>>, vector<8x1xf32>
    tpu.vector_store %arg6[%c0_26, %c0_27], %37 {strides = array<i32>} : memref<8x1xf32, #tpu.memory_space<vmem>>, vector<8x1xf32>,
    %c3_i32 = arith.constant 3 : i32
    %50 = arith.cmpi eq, %arg1, %c3_i32 : i32
    %51 = arith.extui %50 : i1 to i32
    %c0_i32_28 = arith.constant 0 : i32
    %52 = arith.cmpi ne, %51, %c0_i32_28 : i32
    scf.if %52 {
      %c0_29 = arith.constant 0 : index
      %c0_30 = arith.constant 0 : index
      %53 = vector.load %arg8[%c0_29, %c0_30] : memref<8x1xf32, #tpu.memory_space<vmem>>, vector<8x1xf32>
      %cst_31 = arith.constant 3.000000e+01 : f32
      %54 = vector.broadcast %cst_31 : f32 to vector<8x1xf32>
      %55 = arith.mulf %54, %53 : vector<8x1xf32>
      %56 = arith.mulf %53, %53 : vector<8x1xf32>
      %cst_32 = arith.constant 1.000000e+00 : f32
      %57 = vector.broadcast %cst_32 : f32 to vector<8x1xf32>
      %58 = arith.subf %57, %56 : vector<8x1xf32>
      %cst_33 = arith.constant 0.000000e+00 : f32
      %59 = vector.broadcast %cst_33 : f32 to vector<8x1xf32>
      %60 = arith.maximumf %58, %59 : vector<8x1xf32>
      %61 = math.sqrt %60 : vector<8x1xf32>
      %cst_34 = arith.constant 0.980066597 : f32
      %62 = vector.broadcast %cst_34 : f32 to vector<8x1xf32>
      %63 = arith.mulf %53, %62 : vector<8x1xf32>
      %cst_35 = arith.constant 0.198669329 : f32
      %64 = vector.broadcast %cst_35 : f32 to vector<8x1xf32>
      %65 = arith.mulf %61, %64 : vector<8x1xf32>
      %66 = arith.subf %63, %65 : vector<8x1xf32>
      %cst_36 = arith.constant 3.000000e+01 : f32
      %67 = vector.broadcast %cst_36 : f32 to vector<8x1xf32>
      %68 = arith.mulf %67, %66 : vector<8x1xf32>
      %c0_37 = arith.constant 0 : index
      %c0_38 = arith.constant 0 : index
      %69 = vector.load %arg6[%c0_37, %c0_38] : memref<8x1xf32, #tpu.memory_space<vmem>>, vector<8x1xf32>
      %c0_39 = arith.constant 0 : index
      %c0_40 = arith.constant 0 : index
      %70 = vector.load %arg7[%c0_39, %c0_40] : memref<8x1xf32, #tpu.memory_space<vmem>>, vector<8x1xf32>
      %71 = arith.maximumf %69, %68 : vector<8x1xf32>
      %72 = arith.subf %69, %71 : vector<8x1xf32>
      %73 = math.exp %72 : vector<8x1xf32>
      %74 = arith.mulf %70, %73 : vector<8x1xf32>
      %75 = arith.subf %55, %71 : vector<8x1xf32>
      %76 = math.exp %75 : vector<8x1xf32>
      %77 = arith.subf %74, %76 : vector<8x1xf32>
      %cst_41 = arith.constant 0.000000e+00 : f32
      %78 = vector.broadcast %cst_41 : f32 to vector<8x1xf32>
      %79 = arith.maximumf %77, %78 : vector<8x1xf32>
      %80 = arith.subf %68, %71 : vector<8x1xf32>
      %81 = math.exp %80 : vector<8x1xf32>
      %82 = arith.addf %81, %79 : vector<8x1xf32>
      %cst_42 = arith.constant 0.000000e+00 : f32
      %83 = vector.broadcast %cst_42 : f32 to vector<8x1xf32>
      %84 = arith.subf %83, %71 : vector<8x1xf32>
      %85 = math.exp %84 : vector<8x1xf32>
      %cst_43 = arith.constant 9.99999997E-7 : f32
      %86 = vector.broadcast %cst_43 : f32 to vector<8x1xf32>
      %87 = arith.mulf %86, %85 : vector<8x1xf32>
      %88 = arith.addf %82, %87 : vector<8x1xf32>
      %89 = math.log %88 : vector<8x1xf32>
      %90 = arith.addf %71, %89 : vector<8x1xf32>
      %91 = arith.subf %68, %90 : vector<8x1xf32>
      %c0_44 = arith.constant 0 : index
      %c0_45 = arith.constant 0 : index
      %92 = vector.load %arg5[%c0_44, %c0_45] : memref<8x1xf32, #tpu.memory_space<vmem>>, vector<8x1xf32>
      tpu.vector_store %arg5[%c0_44, %c0_45], %91 {strides = array<i32>} : memref<8x1xf32, #tpu.memory_space<vmem>>, vector<8x1xf32>,
    } else {
    }
    return
  }
  func.func @transform_0(%arg0: i32, %arg1: i32) -> (i32, i32) {
    %c0_i32 = arith.constant 0 : i32
    %c0_i32_0 = arith.constant 0 : i32
    return %arg0, %c0_i32 : i32, i32
  }
  func.func @transform_1(%arg0: i32, %arg1: i32) -> (i32, i32) {
    %c0_i32 = arith.constant 0 : i32
    %c0_i32_0 = arith.constant 0 : i32
    return %arg1, %c0_i32 : i32, i32
  }
  func.func @transform_2(%arg0: i32, %arg1: i32) -> (i32, i32) {
    %c0_i32 = arith.constant 0 : i32
    %c0_i32_0 = arith.constant 0 : i32
    return %arg0, %c0_i32 : i32, i32
  }
  func.func @transform_3(%arg0: i32, %arg1: i32) -> (i32, i32) {
    %c0_i32 = arith.constant 0 : i32
    %c0_i32_0 = arith.constant 0 : i32
    return %arg0, %c0_i32 : i32, i32
  }
}

</mosaic_0001>

<bundles_post_ra>
// kernel: tpu_custom_call.1
= control target key start
LH: loop header
LB: loop body
LE: loop exit
PB: predicated region body
PF: predicated region fallthrough
CT: control target
= control target key end

     0   :  { %s1036_s12 = smov 0   ;;  %s1038_s13 = smov 0   ;;  %s1197_s0 = inlined_call_operand.vmem [shape: f32[16,64], index: 0, kind: input, shape index: {}]   ;;  %s1198_s1 = inlined_call_operand.vmem [shape: f32[512,64], index: 1, kind: input, shape index: {}]   ;;  %s1199_s2 = inlined_call_operand.vmem [shape: s32[16,1], index: 2, kind: input, shape index: {}]   ;;  %s1200_s3 = inlined_call_operand.vmem [shape: f32[16,1], index: 3, kind: output, shape index: {}]  }
   0x1   :  { %s1040_s14 = smov 0   ;;  %s1042_s15 = smov 0  }
   0x2   :  { %s1044_s16 = smov 0  }
   0x3 LB: > { %s22_s17 = sadd.s32 1, %s999_s14  ;;  %s25_s18 = sadd.s32 1, %s1003_s15  ;;  %s1007_s16 = sphi %s1044_s16, %s13_s16   ;;  %s1003_s15 = sphi %s1042_s15, %s1206_s15   ;;  %s999_s14 = sphi %s1040_s14, %s1205_s14   ;;  %s995_s13 = sphi %s1038_s13, %s1204_s13   ;;  %s991_s12 = sphi %s1036_s12, %s1203_s12  }
   0x4   : > { %p23_p0 = scmp.ge.s32.totalorder %s22_s17, 4  ;;  %p688_p1 = scmp.ge.s32.totalorder %s1007_s16, 1 }
   0x5   : > { %p168_p2 = scmp.lt.s32.totalorder %s1007_s16, 9 }
   0x6   : > { %s1208_s17 = smov (%p23_p0, %s22_s17), 0  ;;  %s1210_s18 = smov (!%p23_p0, %s25_s18), %s1003_s15 }
   0x7   : > { %p169_p3 = pnand %p688_p1, %p168_p2  ;;  %p27_p4 = scmp.ge.s32.totalorder %s1210_s18, 2 }
   0x8   : > { %p199_p5 = scmp.lt.s32.totalorder (!%p169_p3), %s995_s13, 1  ;;  %s690_s19 = sshll.u32 (!%p169_p3), %s991_s12, 4 }
   0x9   : > { %s1212_s18 = smov (%p27_p4, %s1210_s18), 0  ;;  %172 = sbr.rel (%p169_p3) target bundleno = 795 (0x31b), region = 32 }
   0xa   : > { %p204_p6 = scmp.lt.s32.totalorder (!%p169_p3), %s690_s19, 63  ;;  %p694_p7 = scmp.ne.s32.totalorder (!%p169_p3), %s991_s12, 0 }
  0x10   : > { %s1214_s13 = smov (!%p199_p5, %s995_s13), 1  ;;  %s1216_s19 = smov (!%p204_p6, %s690_s19), 63 }
  0x11   : > { %s1069_s20 = sshll.u32 %s1214_s13, 3  ;;  %s691_s24 = sshll.u32 %s1216_s19, 3  ;;  %vm221_vm0 = vcmask (!%p694_p7), 7168   ;;  %v1009_v0 = vmov (!%p694_p7), -inf   ;;  %v1010_v1 = vmov (!%p694_p7), 0.0  }
  0x12   : > { %s202_s23 = scalar_lea.vmem %s1197_s0, %s1069_s20  ;;  %s1078_s27 = scalar_lea.vmem %s1198_s1, %s691_s24  ;;  %222 = vst.msk [vmem:[#allocation2] sm:$0xff] (!%p694_p7), %vm221_vm0, %v1009_v0  ;;  %223 = vst.msk [vmem:[#allocation3] sm:$0xff] (!%p694_p7), %vm221_vm0, %v1010_v1 }
  0x13   : > { %s212_s30 = scalar_lea.vmem %s1199_s2, %s1069_s20  ;;  %s216_s6 = scalar_lea.vmem %s1200_s3, %s1069_s20  ;;  %224 = vst.msk [vmem:[#allocation4] sm:$0xff] (!%p694_p7), %vm221_vm0, %v1010_v1 }
  0x14   : > { %220 = sbr.rel (%p694_p7) target bundleno = 27 (0x1b), region = 36 }
  0x1b PF: > { %v226_v2 = vld [vmem:[%s1078_s27] sm:$0xff]  ;;  %v227_v3 = vld [vmem:[%s1078_s27 + $0x8] sm:$0xff]  ;;  %vm258_vm1 = vcmask 523264   ;;  %v1011_v4 = vmov 0.0|0.0   ;;  %v228_v8 = vld [vmem:[%s1078_s27 + $0x10] sm:$0xff]  ;;  %vm1012_vm3 = vmmov 0   ;;  %v503_v62 = vlaneseq }
  0x1c   : > { %838 = vmatprep.subr.bf16.mxu0 %v1011_v4  ;;  %v242_v5 = vmul.f32 %v226_v2, %v226_v2  ;;  %v243_v6 = vmul.f32 %v227_v3, %v227_v3  ;;  %870 = vmatprep.subr.bf16.mxu1 %v1011_v4  ;;  %vm1095_vm2 = vmpackc.low %vm258_vm1, %vm258_vm1  ;;  %v229_v9 = vld [vmem:[%s1078_s27 + $0x18] sm:$0xff]  ;;  %v871_v10 = vpack.c.bf16 %v227_v3, %v226_v2  ;;  %v1013_v11 = vmov 0.0   ;;  %v516_v16 = vld [vmem:[%s212_s30] sm:$0xff]  ;;  %s730_s11 = sshll.u32 %s991_s12, 7  ;;  %p731_p8 = scmp.ne.s32.totalorder %s991_s12, 3 }
  0x1d   : > { %800 = vmatprep.mubr.msk.f32.mxu0 %vm1012_vm3, %v1013_v11  ;;  %835 = vmatprep.mubr.msk.f32.mxu1 %vm1012_vm3, %v1013_v11  ;;  %v244_v13 = vmul.f32 %v228_v8, %v228_v8  ;;  %v245_v14 = vmul.f32 %v229_v9, %v229_v9  ;;  %v875_v15 = vpack.c.bf16 %v229_v9, %v228_v8  ;;  %v230_v18 = vld [vmem:[%s1078_s27 + $0x20] sm:$0xff]  ;;  %v231_v19 = vld [vmem:[%s1078_s27 + $0x28] sm:$0xff]  ;;  %v1014_v20 = vmov 0   ;;  %v232_v25 = vld [vmem:[%s1078_s27 + $0x30] sm:$0xff] }
  0x1e   : > { %v839_v12 = vpack.c.bf16 %v243_v6, %v242_v5  ;;  %873 = vmatpush3.bf16.xpose.msk.msra.mxu1 %vm1095_vm2, %v871_v10  ;;  %950 = vset.pattern.permute.xlu1 %v1014_v20  ;;  %v246_v21 = vmul.f32 %v230_v18, %v230_v18  ;;  %v247_v22 = vmul.f32 %v231_v19, %v231_v19  ;;  %v233_v26 = vld [vmem:[%s1078_s27 + $0x38] sm:$0xff]  ;;  %v234_v31 = vld [vmem:[%s1078_s27 + $0x40] sm:$0xff]  ;;  %v235_v32 = vld [vmem:[%s1078_s27 + $0x48] sm:$0xff]  ;;  %v1015_v56 = vmov 1.0  }
  0x1f   : > { %874 = vmatprep.subr.bf16.mxu1 %v1011_v4  ;;  %v843_v17 = vpack.c.bf16 %v245_v14, %v244_v13  ;;  %949 = vset.pattern.permute.xlu0 %v1014_v20  ;;  %v879_v23 = vpack.c.bf16 %v231_v19, %v230_v18  ;;  %v248_v27 = vmul.f32 %v232_v25, %v232_v25  ;;  %v236_v37 = vld [vmem:[%s1078_s27 + $0x50] sm:$0xff]  ;;  %v237_v38 = vld [vmem:[%s1078_s27 + $0x58] sm:$0xff]  ;;  %v238_v43 = vld [vmem:[%s1078_s27 + $0x60] sm:$0xff]  ;;  %v504_v63 = vshrl.u32 %v503_v62, 7 }
  0x20   : > { %841 = vmatpush3.bf16.xpose.msk.msra.mxu0 %vm1095_vm2, %v839_v12  ;;  %518 = vperm.xlu1 %950, %v516_v16   ;;  %v847_v24 = vpack.c.bf16 %v247_v22, %v246_v21  ;;  %v249_v28 = vmul.f32 %v233_v26, %v233_v26  ;;  %v883_v29 = vpack.c.bf16 %v233_v26, %v232_v25  ;;  %v239_v44 = vld [vmem:[%s1078_s27 + $0x68] sm:$0xff]  ;;  %v240_v49 = vld [vmem:[%s1078_s27 + $0x70] sm:$0xff]  ;;  %v241_v50 = vld [vmem:[%s1078_s27 + $0x78] sm:$0xff]  ;;  %v512_v0 = vand.u32 127, %v503_v62 }
  0x21   : > { %842 = vmatprep.subr.bf16.mxu0 %v1011_v4  ;;  %v250_v33 = vmul.f32 %v234_v31, %v234_v31  ;;  %v251_v34 = vmul.f32 %v235_v32, %v235_v32  ;;  %v887_v35 = vpack.c.bf16 %v235_v32, %v234_v31  ;;  %v252_v39 = vmul.f32 %v236_v37, %v236_v37  ;;  %v225_v55 = vld [vmem:[%s202_s23] sm:$0xff]  ;;  %v521_v11 = vld [vmem:[#allocation4] sm:$0xff] }
  0x22   : > { %v851_v30 = vpack.c.bf16 %v249_v28, %v248_v27  ;;  %v253_v40 = vmul.f32 %v237_v38, %v237_v38  ;;  %v891_v41 = vpack.c.bf16 %v237_v38, %v236_v37  ;;  %v254_v45 = vmul.f32 %v238_v43, %v238_v43  ;;  %v528_v12 = vld [vmem:[#allocation2] sm:$0xff] }
  0x23   : > { %v855_v36 = vpack.c.bf16 %v251_v34, %v250_v33  ;;  %v255_v46 = vmul.f32 %v239_v44, %v239_v44  ;;  %v895_v47 = vpack.c.bf16 %v239_v44, %v238_v43  ;;  %v256_v51 = vmul.f32 %v240_v49, %v240_v49 }
  0x24   : > { %v859_v42 = vpack.c.bf16 %v253_v40, %v252_v39  ;;  %v257_v52 = vmul.f32 %v241_v50, %v241_v50  ;;  %v899_v53 = vpack.c.bf16 %v241_v50, %v240_v49  ;;  %v505_v1 = vsub.s32 0, %v504_v63 }
  0x25   : > { %v863_v48 = vpack.c.bf16 %v255_v46, %v254_v45  ;;  %v514_v2 = vstv %s730_s11  ;;  %vm526_vm5 = vcmask 7168  }
  0x26   : > { %877 = vmatpush3.bf16.xpose.msk.msra.mxu1 %vm1095_vm2, %v875_v15  ;;  %v867_v54 = vpack.c.bf16 %v257_v52, %v256_v51 }
  0x27   : > { %878 = vmatprep.subr.bf16.mxu1 %v1011_v4 }
  0x28   : > { %845 = vmatpush3.bf16.xpose.msk.msra.mxu0 %vm1095_vm2, %v843_v17 }
  0x29   : > { %846 = vmatprep.subr.bf16.mxu0 %v1011_v4 }
  0x2e   : > { %881 = vmatpush3.bf16.xpose.msk.msra.mxu1 %vm1095_vm2, %v879_v23 }
  0x2f   : > { %882 = vmatprep.subr.bf16.mxu1 %v1011_v4 }
  0x30   : > { %849 = vmatpush3.bf16.xpose.msk.msra.mxu0 %vm1095_vm2, %v847_v24  ;;  %v532_v24 = vld [vmem:[#allocation3] sm:$0xff] }
  0x31   : > { %850 = vmatprep.subr.bf16.mxu0 %v1011_v4 }
  0x36   : > { %885 = vmatpush3.bf16.xpose.msk.msra.mxu1 %vm1095_vm2, %v883_v29 }
  0x37   : > { %886 = vmatprep.subr.bf16.mxu1 %v1011_v4 }
  0x38   : > { %853 = vmatpush3.bf16.xpose.msk.msra.mxu0 %vm1095_vm2, %v851_v30 }
  0x39   : > { %854 = vmatprep.subr.bf16.mxu0 %v1011_v4 }
  0x3e   : > { %889 = vmatpush3.bf16.xpose.msk.msra.mxu1 %vm1095_vm2, %v887_v35 }
  0x3f   : > { %890 = vmatprep.subr.bf16.mxu1 %v1011_v4 }
  0x40   : > { %857 = vmatpush3.bf16.xpose.msk.msra.mxu0 %vm1095_vm2, %v855_v36 }
  0x41   : > { %858 = vmatprep.subr.bf16.mxu0 %v1011_v4 }
  0x46   : > { %893 = vmatpush3.bf16.xpose.msk.msra.mxu1 %vm1095_vm2, %v891_v41 }
  0x47   : > { %894 = vmatprep.subr.bf16.mxu1 %v1011_v4 }
  0x48   : > { %861 = vmatpush3.bf16.xpose.msk.msra.mxu0 %vm1095_vm2, %v859_v42 }
  0x49   : > { %862 = vmatprep.subr.bf16.mxu0 %v1011_v4 }
  0x4e   : > { %897 = vmatpush3.bf16.xpose.msk.msra.mxu1 %vm1095_vm2, %v895_v47 }
  0x4f   : > { %898 = vmatprep.subr.bf16.mxu1 %v1011_v4 }
  0x50   : > { %865 = vmatpush3.bf16.xpose.msk.msra.mxu0 %vm1095_vm2, %v863_v48 }
  0x51   : > { %866 = vmatprep.subr.bf16.mxu0 %v1011_v4  ;;  %v515_v4 = vadd.s32 %v514_v2, %v512_v0 }
  0x56   : > { %901 = vmatpush3.bf16.xpose.msk.msra.mxu1 %vm1095_vm2, %v899_v53 }
  0x58   : > { %869 = vmatpush3.bf16.xpose.msk.msra.mxu0 %vm1095_vm2, %v867_v54 }
  0x5d   : > { %836 = vmatmul.mubr.msk.f32.vlgmr.msra.gmra.mrb[0].mxu1 %vm258_vm1, %v225_v55 }
  0x5f   : > { %801 = vmatmul.mubr.msk.f32.vlgmr.msra.gmra.mrb[0].mxu0 %vm258_vm1, %v1015_v56 }
  0x9f   : > { %v519_v6 = vpop.permute.xlu1 %518 }
  0xa0   : > { %vm520_vm4 = vcmp.eq.s32.totalorder %v515_v4, %v519_v6 }
 0x130   : > { %v499_v57 = vpop.f32.mrb[0].mxu1 }
 0x131   : > { %v837_v59 = vpop.f32.mrb[1].mxu1 }
 0x132   : > { %v376_v58 = vpop.f32.mrb[0].mxu0 }
 0x133   : > { %v380_v60 = vmax.f32 %v376_v58, 1e-24  ;;  %v802_v61 = vpop.f32.mrb[1].mxu0 }
 0x135   : > { %951 = vrsqrt.f32 %v380_v60 }
 0x13f   : > { %v952_v3 = vpop.eup %951 }
 0x140   : > { %v506_v5 = vrot.slane %v952_v3, %v505_v1 }
 0x142   : > { %v507_v7 = vmul.f32 %v506_v5, %v499_v57 }
 0x144   : > { %v729_v8 = vclamps-f32 %v507_v7, 1.0 }
 0x146   : > { %v522_v9 = vsel %vm520_vm4, %v729_v8, 0.0  ;;  %v510_v10 = vmul.f32 30.0, %v729_v8 }
 0x147   : > { %523 = vadd.xlane.f32.xlu1 %v522_v9 }
 0x148   : > { %529 = vmax.xlane.f32.xlu0 %v510_v10 }
 0x1d4   : > { %v524_v13 = vpop.xlane.xlu1 %523 }
 0x1d5   : > { %v525_v14 = vadd.f32 %v524_v13, %v521_v11  ;;  %v530_v15 = vpop.xlane.xlu0 %529 }
 0x1d6   : > { %v531_v16 = vmax.f32 %v528_v12, %v530_v15 }
 0x1d7   : > { %527 = vst.msk [vmem:[#allocation4] sm:$0xff] %vm526_vm5, %v525_v14 }
 0x1d8   : > { %v533_v17 = vsub.f32 %v528_v12, %v531_v16  ;;  %549 = vst.msk [vmem:[#allocation2] sm:$0xff] %vm526_vm5, %v531_v16  ;;  %539 = vperm.xlu0 %949, %v531_v16  }
 0x1da   : > { %v534_v22 = vmul.f32 1.442695, %v533_v17 }
 0x1de   : > { %v554_v28 = vld [vmem:[#allocation4] sm:$0xff] (!%p731_p8) }
 0x1df   : > { %v556_v29 = vmul.f32 (!%p731_p8), %v554_v28, %v554_v28  ;;  %v566_v36 = vmul.f32 (!%p731_p8), 0.9800666, %v554_v28  ;;  %v570_v40 = vld [vmem:[#allocation2] sm:$0xff] (!%p731_p8)  ;;  %v555_v41 = vmul.f32 (!%p731_p8), 30.0, %v554_v28 }
 0x1e1   : > { %v557_v30 = vsub.f32 (!%p731_p8), 1.0, %v556_v29 }
 0x1e3   : > { %v558_v31 = vmax.f32 (!%p731_p8), %v557_v30, 0.0 }
 0x1e5   : > { %vm561_vm6 = vcmp.eq.f32.partialorder (!%p731_p8), %v558_v31, inf  ;;  %v564_v33 = vand.u32 (!%p731_p8), 2147483648, %v558_v31  ;;  %vm563_vm7 = vcmp.eq.f32.partialorder (!%p731_p8), %v558_v31, 0.0 }
 0x257   : > { %v540_v18 = vpop.permute.xlu0 %539 }
 0x258   : > { %v542_v19 = vsub.f32 %v510_v10, %v540_v18 }
 0x25a   : > { %v543_v20 = vmul.f32 1.442695, %v542_v19 }
 0x25c   : > { %953 = vpow2.f32 %v543_v20 }
 0x25d   : > { %955 = vpow2.f32 %v534_v22 }
 0x25e   : > { %957 = vrsqrt.f32 (!%p731_p8), %v558_v31 }
 0x266   : > { %v954_v21 = vpop.eup %953 }
 0x267   : > { %545 = vadd.xlane.f32.xlu1 %v954_v21  ;;  %v956_v23 = vpop.eup %955 }
 0x268   : > { %v536_v25 = vmul.f32 %v956_v23, %v532_v24  ;;  %v958_v32 = vpop.eup (!%p731_p8), %957 }
 0x269   : > { %v560_v34 = vmul.f32 (!%p731_p8), %v958_v32, %v558_v31 }
 0x26b   : > { %v562_v35 = vsel (!%p731_p8), %vm561_vm6, %v558_v31, %v560_v34 }
 0x26c   : > { %v565_v37 = vsel (!%p731_p8), %vm563_vm7, %v564_v33, %v562_v35 }
 0x26d   : > { %v567_v38 = vmul.f32 (!%p731_p8), 0.19866933, %v565_v37 }
 0x26f   : > { %v568_v39 = vsub.f32 (!%p731_p8), %v566_v36, %v567_v38 }
 0x271   : > { %v569_v42 = vmul.f32 (!%p731_p8), 30.0, %v568_v39 }
 0x273   : > { %v572_v43 = vmax.f32 (!%p731_p8), %v570_v40, %v569_v42 }
 0x275   : > { %v573_v44 = vsub.f32 (!%p731_p8), %v570_v40, %v572_v43  ;;  %v577_v45 = vsub.f32 (!%p731_p8), %v555_v41, %v572_v43  ;;  %v582_v46 = vsub.f32 (!%p731_p8), %v569_v42, %v572_v43  ;;  %v586_v47 = vsub.f32 (!%p731_p8), 0.0, %v572_v43 }
 0x277   : > { %v574_v48 = vmul.f32 (!%p731_p8), 1.442695, %v573_v44  ;;  %v578_v49 = vmul.f32 (!%p731_p8), 1.442695, %v577_v45  ;;  %v587_v50 = vmul.f32 (!%p731_p8), 1.442695, %v586_v47 }
 0x278   : > { %v583_v51 = vmul.f32 (!%p731_p8), 1.442695, %v582_v46 }
 0x279   : > { %959 = vpow2.f32 (!%p731_p8), %v574_v48 }
 0x27a   : > { %961 = vpow2.f32 (!%p731_p8), %v578_v49 }
 0x27b   : > { %963 = vpow2.f32 (!%p731_p8), %v587_v50 }
 0x27c   : > { %965 = vpow2.f32 (!%p731_p8), %v583_v51 }
 0x283   : > { %v960_v53 = vpop.eup (!%p731_p8), %959 }
 0x284   : > { %v962_v54 = vpop.eup (!%p731_p8), %961 }
 0x285   : > { %v964_v56 = vpop.eup (!%p731_p8), %963 }
 0x286   : > { %v966_v58 = vpop.eup (!%p731_p8), %965  ;;  %v589_v60 = vmul.f32 (!%p731_p8), 1e-06, %v964_v56 }
 0x2f1   : > { %553 = sbr.rel (%p731_p8) target bundleno = 795 (0x31b), region = 40 }
 0x2f4   : > { %v546_v26 = vpop.xlane.xlu1 %545 }
 0x2f5   : > { %v547_v27 = vadd.f32 %v546_v26, %v536_v25 }
 0x2f7   : > { %548 = vst.msk [vmem:[#allocation3] sm:$0xff] %vm526_vm5, %v547_v27 }
 0x2fe   : > { %v571_v52 = vld [vmem:[#allocation3] sm:$0xff] }
 0x2ff   : > { %v576_v55 = vmul.f32 %v960_v53, %v571_v52 }
 0x301   : > { %v580_v57 = vsub.f32 %v576_v55, %v962_v54 }
 0x303   : > { %v581_v59 = vmax.f32 %v580_v57, 0.0 }
 0x305   : > { %v585_v61 = vadd.f32 %v966_v58, %v581_v59 }
 0x307   : > { %v590_v62 = vadd.f32 %v589_v60, %v585_v61 }
 0x309   : > { %967 = vlog2.f32 %v590_v62 }
 0x313   : > { %v968_v63 = vpop.eup %967 }
 0x314   : > { %v592_v0 = vmul.f32 0.6931472, %v968_v63 }
 0x316   : > { %v593_v1 = vadd.f32 %v592_v0, %v572_v43 }
 0x318   : > { %v594_v2 = vsub.f32 %v569_v42, %v593_v1 }
 0x31a   : > { %595 = vst.msk [vmem:[%s216_s6] sm:$0xff] %vm526_vm5, %v594_v2 }
 0x31b PF: > { %s13_s16 = sadd.s32 1, %s1007_s16   ;;  %s1203_s12 = smov %s999_s14 }
 0x31c   : > { %p10_p9 = scmp.ge.s32.totalorder %s13_s16, 10   ;;  %s1204_s13 = smov %s1003_s15 }
 0x31d   : > { %s1205_s14 = smov %s1208_s17  ;;  %s1206_s15 = smov %s1212_s18 }
 0x31e   :  { %12 = sbr.rel (!%p10_p9) target bundleno = 3 (0x3), region = 76 }

</bundles_post_ra>
